<compile_context>
chip_gen: v7x
topology: tpu7x:2x2x1
jax: 0.10.0
libtpu: 0.0.40
codegen_flags: <defaults>
</compile_context>

<pallas_src>
import functools
import math

import jax
import jax.numpy as jnp
from jax.experimental import pallas as pl
from jax.experimental.pallas import tpu as pltpu


def _round_up(a: int, b: int) -> int:
    return ((a + b - 1) // b) * b


# ---------------------------------------------------------------------------
# Fused linear: y = x @ W.T (+ b) (+ GELU)
# ---------------------------------------------------------------------------
def _linear_kernel(x_ref, w_ref, b_ref, o_ref, *, activation):
    # x_ref: (tm, K), w_ref: (tn, K)  ->  o_ref: (tm, tn)
    acc = jax.lax.dot_general(
        x_ref[...],
        w_ref[...],
        dimension_numbers=(((1,), (1,)), ((), ())),
        preferred_element_type=jnp.float32,
    )
    acc = acc + b_ref[...].astype(jnp.float32)
    if activation == "gelu":
        # TODO(synk): nn.GELU() default is exact erf; tanh approximation used.
        c = math.sqrt(2.0 / math.pi)
        acc = 0.5 * acc * (1.0 + jnp.tanh(c * (acc + 0.044715 * acc * acc * acc)))
    o_ref[...] = acc.astype(o_ref.dtype)


def linear(x2d, w, b=None, *, activation=None, compute_dtype=None,
           tm_cap=256, tn_cap=512):
    """x2d: (M, K); w: (N, K) (PyTorch nn.Linear layout); b: (N,) or None."""
    M, K = x2d.shape
    N, Kw = w.shape
    assert K == Kw, "contraction dim mismatch"
    out_dtype = x2d.dtype

    if compute_dtype is not None:
        x2d = x2d.astype(compute_dtype)
        w = w.astype(compute_dtype)

    itemsize = jnp.dtype(x2d.dtype).itemsize
    # Keep a single (tn, K) weight stripe under ~6 MiB so double-buffering
    # stays inside the scoped-VMEM budget even for large K.
    tn_mem = max(128, ((6 * 1024 * 1024) // (K * itemsize)) // 128 * 128)
    tm = min(tm_cap, _round_up(M, 8))
    tn = min(tn_cap, tn_mem, _round_up(N, 128))

    M_pad = _round_up(M, tm)
    N_pad = _round_up(N, tn)
    if M_pad != M:
        x2d = jnp.pad(x2d, ((0, M_pad - M), (0, 0)))
    if N_pad != N:
        w = jnp.pad(w, ((0, N_pad - N), (0, 0)))
    if b is None:
        b2d = jnp.zeros((1, N_pad), jnp.float32)
    else:
        b2d = jnp.pad(b.astype(jnp.float32).reshape(1, N),
                      ((0, 0), (0, N_pad - N)))

    # Output-column (weight) stripes OUTER: each weight stripe is read from
    # HBM exactly once; activation tiles are what get re-streamed.
    grid = (N_pad // tn, M_pad // tm)

    out = pl.pallas_call(
        functools.partial(_linear_kernel, activation=activation),
        out_shape=jax.ShapeDtypeStruct((M_pad, N_pad), out_dtype),
        grid_spec=pltpu.PrefetchScalarGridSpec(
            num_scalar_prefetch=0,
            grid=grid,
            in_specs=[
                pl.BlockSpec((tm, K), lambda j, i: (i, 0)),   # activations
                pl.BlockSpec((tn, K), lambda j, i: (j, 0)),   # weight stripe
                pl.BlockSpec((1, tn), lambda j, i: (0, j)),   # bias stripe
            ],
            out_specs=pl.BlockSpec((tm, tn), lambda j, i: (i, j)),
        ),
        compiler_params=pltpu.CompilerParams(
            dimension_semantics=("parallel", "parallel"),
            vmem_limit_bytes=32 * 1024 * 1024,
        ),
    )(x2d, w, b2d)
    return out[:M, :N]


# ---------------------------------------------------------------------------
# LayerNorm (torch-style: unbiased std, division by (std + eps))
# ---------------------------------------------------------------------------
def _layernorm_kernel(x_ref, w_ref, b_ref, o_ref, *, eps, d):
    x = x_ref[...].astype(jnp.float32)
    mean = jnp.mean(x, axis=-1, keepdims=True)
    xc = x - mean
    var = jnp.sum(xc * xc, axis=-1, keepdims=True) * (1.0 / (d - 1))
    std = jnp.sqrt(var)
    y = w_ref[...].astype(jnp.float32) * (xc / (std + eps)) \
        + b_ref[...].astype(jnp.float32)
    o_ref[...] = y.astype(o_ref.dtype)


def layer_norm(x2d, w, b, *, eps, tm_cap=512):
    M, D = x2d.shape
    tm = min(tm_cap, _round_up(M, 8))
    M_pad = _round_up(M, tm)
    if M_pad != M:
        x2d = jnp.pad(x2d, ((0, M_pad - M), (0, 0)))
    out = pl.pallas_call(
        functools.partial(_layernorm_kernel, eps=eps, d=D),
        out_shape=jax.ShapeDtypeStruct((M_pad, D), x2d.dtype),
        grid_spec=pltpu.PrefetchScalarGridSpec(
            num_scalar_prefetch=0,
            grid=(M_pad // tm,),
            in_specs=[
                pl.BlockSpec((tm, D), lambda i: (i, 0)),
                pl.BlockSpec((1, D), lambda i: (0, 0)),
                pl.BlockSpec((1, D), lambda i: (0, 0)),
            ],
            out_specs=pl.BlockSpec((tm, D), lambda i: (i, 0)),
        ),
        compiler_params=pltpu.CompilerParams(
            dimension_semantics=("parallel",),
            vmem_limit_bytes=32 * 1024 * 1024,
        ),
    )(x2d, w.reshape(1, D), b.reshape(1, D))
    return out[:M]


# ---------------------------------------------------------------------------
# Causal multi-head attention core (per (batch, head) grid cell)
# ---------------------------------------------------------------------------
def _attention_kernel(q_ref, k_ref, v_ref, o_ref, *, scale, seq_len, d_head):
    q = q_ref[...].reshape(seq_len, d_head).astype(jnp.float32)
    k = k_ref[...].reshape(seq_len, d_head).astype(jnp.float32)
    v = v_ref[...].reshape(seq_len, d_head).astype(jnp.float32)
    s = jax.lax.dot_general(
        q, k, dimension_numbers=(((1,), (1,)), ((), ())),
        preferred_element_type=jnp.float32) * scale
    row = jax.lax.broadcasted_iota(jnp.int32, (seq_len, seq_len), 0)
    col = jax.lax.broadcasted_iota(jnp.int32, (seq_len, seq_len), 1)
    s = jnp.where(col <= row, s, -1e30)
    s = s - jnp.max(s, axis=-1, keepdims=True)
    p = jnp.exp(s)
    p = p / jnp.sum(p, axis=-1, keepdims=True)
    o = jnp.dot(p, v, preferred_element_type=jnp.float32)
    o_ref[...] = o.reshape(1, 1, seq_len, d_head).astype(o_ref.dtype)


def causal_attention(q, k, v):
    """q, k, v: (B, H, T, dh) -> (B, H, T, dh)."""
    B, H, T, dh = q.shape
    scale = 1.0 / math.sqrt(dh)
    spec = pl.BlockSpec((1, 1, T, dh), lambda b, h: (b, h, 0, 0))
    return pl.pallas_call(
        functools.partial(_attention_kernel, scale=scale, seq_len=T, d_head=dh),
        out_shape=jax.ShapeDtypeStruct((B, H, T, dh), q.dtype),
        grid_spec=pltpu.PrefetchScalarGridSpec(
            num_scalar_prefetch=0,
            grid=(B, H),
            in_specs=[spec, spec, spec],
            out_specs=spec,
        ),
        compiler_params=pltpu.CompilerParams(
            dimension_semantics=("parallel", "parallel"),
            vmem_limit_bytes=32 * 1024 * 1024,
        ),
    )(q, k, v)


# ---------------------------------------------------------------------------
# Full GPT-2 forward (past=None path)
# ---------------------------------------------------------------------------
@functools.partial(jax.jit, static_argnames=("n_head", "eps"))
def gpt2_forward(params, ids, *, n_head, eps):
    B, T = ids.shape
    D = params["wte"].shape[1]

    # Token + learned ('standard') position embeddings.
    # TODO(synk): embedding row-gather left in XLA (jnp.take); a Pallas
    # scalar-prefetch pl.Element gather is possible but low value here.
    x = jnp.take(params["wte"], ids, axis=0) + params["wpe"][None, :T, :]
    x2d = x.reshape(B * T, D)
    dh = D // n_head

    presents = []
    for blk in params["blocks"]:
        # --- attention sub-block ---
        h = layer_norm(x2d, blk["ln1_w"], blk["ln1_b"], eps=eps)
        qkv = linear(h, blk["attn_qkv_w"], blk["attn_qkv_b"])
        q, k, v = jnp.split(qkv, 3, axis=-1)

        def to_heads(t):
            return t.reshape(B, T, n_head, dh).transpose(0, 2, 1, 3)

        qh, kh, vh = to_heads(q), to_heads(k), to_heads(v)
        attn = causal_attention(qh, kh, vh)
        attn2d = attn.transpose(0, 2, 1, 3).reshape(B * T, D)
        attn_out = linear(attn2d, blk["attn_proj_w"], blk["attn_proj_b"])
        x2d = x2d + attn_out
        presents.append(jnp.stack([kh, vh]))  # present = (k, v) cache

        # --- MLP sub-block ---
        h2 = layer_norm(x2d, blk["ln2_w"], blk["ln2_b"], eps=eps)
        m = linear(h2, blk["mlp_fc_w"], blk["mlp_fc_b"], activation="gelu")
        m = linear(m, blk["mlp_proj_w"], blk["mlp_proj_b"])
        x2d = x2d + m
        # dropout: drop=None in the reference config -> identity.

    x2d = layer_norm(x2d, params["lnf_w"], params["lnf_b"], eps=eps)

    # Tied-embedding LM head (Projection): logits = x @ wte.T, no bias.
    # bf16 inputs + f32 MXU accumulation halve weight-HBM traffic; weight stays
    # in its native (vocab, d_model) layout (no host-side transpose).
    logits = linear(x2d, params["wte"], None,
                    compute_dtype=jnp.bfloat16, tn_cap=1024)
    V = params["wte"].shape[0]
    return logits.reshape(B, T, V), presents


# ---------------------------------------------------------------------------
# Parameter init + pure-JAX reference (same math) for a correctness check
# ---------------------------------------------------------------------------
def init_params(key, *, vocab_size, seq_len, d_model, n_layer, mlp_scale):
    keys = iter(jax.random.split(key, 4 + 12 * n_layer))

    def nrm(shape, scale=0.02):
        return jax.random.normal(next(keys), shape, dtype=jnp.float32) * scale

    hidden = mlp_scale * d_model
    params = {
        "wte": nrm((vocab_size, d_model)),
        "wpe": nrm((seq_len, d_model)),
        "lnf_w": 1.0 + nrm((d_model,), 0.05),
        "lnf_b": nrm((d_model,)),
        "blocks": [],
    }
    for _ in range(n_layer):
        params["blocks"].append({
            "ln1_w": 1.0 + nrm((d_model,), 0.05),
            "ln1_b": nrm((d_model,)),
            "attn_qkv_w": nrm((3 * d_model, d_model)),
            "attn_qkv_b": nrm((3 * d_model,)),
            "attn_proj_w": nrm((d_model, d_model)),
            "attn_proj_b": nrm((d_model,)),
            "ln2_w": 1.0 + nrm((d_model,), 0.05),
            "ln2_b": nrm((d_model,)),
            "mlp_fc_w": nrm((hidden, d_model)),
            "mlp_fc_b": nrm((hidden,)),
            "mlp_proj_w": nrm((d_model, hidden)),
            "mlp_proj_b": nrm((d_model,)),
        })
    return params


def gpt2_reference(params, ids, *, n_head, eps):
    B, T = ids.shape
    D = params["wte"].shape[1]
    dh = D // n_head

    def ln(x, w, b):
        mean = jnp.mean(x, axis=-1, keepdims=True)
        xc = x - mean
        var = jnp.sum(xc * xc, axis=-1, keepdims=True) / (x.shape[-1] - 1)
        return w * (xc / (jnp.sqrt(var) + eps)) + b

    def gelu(x):
        c = math.sqrt(2.0 / math.pi)
        return 0.5 * x * (1.0 + jnp.tanh(c * (x + 0.044715 * x ** 3)))

    x = jnp.take(params["wte"], ids, axis=0) + params["wpe"][None, :T, :]
    for blk in params["blocks"]:
        h = ln(x, blk["ln1_w"], blk["ln1_b"])
        qkv = h @ blk["attn_qkv_w"].T + blk["attn_qkv_b"]
        q, k, v = jnp.split(qkv, 3, axis=-1)

        def heads(t):
            return t.reshape(B, T, n_head, dh).transpose(0, 2, 1, 3)

        qh, kh, vh = heads(q), heads(k), heads(v)
        s = jnp.einsum("bhqd,bhkd->bhqk", qh, kh) / math.sqrt(dh)
        mask = jnp.tril(jnp.ones((T, T), bool))
        s = jnp.where(mask[None, None], s, -1e30)
        p = jax.nn.softmax(s, axis=-1)
        a = jnp.einsum("bhqk,bhkd->bhqd", p, vh)
        a = a.transpose(0, 2, 1, 3).reshape(B, T, D)
        x = x + (a @ blk["attn_proj_w"].T + blk["attn_proj_b"])
        h2 = ln(x, blk["ln2_w"], blk["ln2_b"])
        m = gelu(h2 @ blk["mlp_fc_w"].T + blk["mlp_fc_b"])
        x = x + (m @ blk["mlp_proj_w"].T + blk["mlp_proj_b"])
    x = ln(x, params["lnf_w"], params["lnf_b"])
    xq = x.astype(jnp.bfloat16).astype(jnp.float32)
    wq = params["wte"].astype(jnp.bfloat16).astype(jnp.float32)
    return jnp.einsum("btd,vd->btv", xq, wq)


if __name__ == "__main__":
    batch, seq_len, d_model, n_head, n_layer = 2, 8, 32, 4, 2
    vocab_size, mlp_scale, eps = 64, 4, 1e-7

    key = jax.random.PRNGKey(0)
    k_params, k_ids = jax.random.split(key)
    params = init_params(k_params, vocab_size=vocab_size, seq_len=seq_len,
                         d_model=d_model, n_layer=n_layer, mlp_scale=mlp_scale)
    ids = jax.random.randint(k_ids, (batch, seq_len), 0, vocab_size)

    logits, presents = gpt2_forward(params, ids, n_head=n_head, eps=eps)
    logits = jax.block_until_ready(logits)

    assert logits.shape == (batch, seq_len, vocab_size)
    assert len(presents) == n_layer

    ref = gpt2_reference(params, ids, n_head=n_head, eps=eps)
    max_err = float(jnp.max(jnp.abs(logits - ref)))
    assert jnp.allclose(logits, ref, atol=2e-2, rtol=2e-2), f"max_err={max_err}"

    print("KERNEL_OK")
</pallas_src>

<mosaic_0001>
module attributes {stable_mosaic.version = 11 : i64} {
  func.func @_layernorm_kernel(%arg0: i32, %arg1: memref<16x32xf32, #tpu.memory_space<vmem>>, %arg2: memref<1x32xf32, #tpu.memory_space<vmem>>, %arg3: memref<1x32xf32, #tpu.memory_space<vmem>>, %arg4: memref<16x32xf32, #tpu.memory_space<vmem>>) attributes {dimension_semantics = [#tpu.dimension_semantics<parallel>], iteration_bounds = array<i64: 1>, scalar_prefetch = 0 : i64, scratch_operands = 0 : i64, tpu.core_type = #tpu.core_type<tc>, window_params = [{transform_indices = @transform_0, window_bounds = array<i64: 16, 32>}, {pipeline_mode = #tpu.pipeline_mode<synchronous>, transform_indices = @transform_1, window_bounds = array<i64: 1, 32>}, {pipeline_mode = #tpu.pipeline_mode<synchronous>, transform_indices = @transform_2, window_bounds = array<i64: 1, 32>}, {transform_indices = @transform_3, window_bounds = array<i64: 16, 32>}]} {
    %c0 = arith.constant 0 : index
    %c0_0 = arith.constant 0 : index
    %0 = vector.load %arg1[%c0, %c0_0] : memref<16x32xf32, #tpu.memory_space<vmem>>, vector<16x32xf32>
    %cst = arith.constant dense<0.000000e+00> : vector<16xf32>
    %1 = vector.multi_reduction <add>, %0, %cst [1] : vector<16x32xf32> to vector<16xf32>
    %2 = vector.shape_cast %1 : vector<16xf32> to vector<16x1xf32>
    %cst_1 = arith.constant 3.200000e+01 : f32
    %3 = vector.broadcast %cst_1 : f32 to vector<16x1xf32>
    %4 = arith.divf %2, %3 : vector<16x1xf32>
    %5 = vector.broadcast %4 : vector<16x1xf32> to vector<16x32xf32>
    %6 = arith.subf %0, %5 : vector<16x32xf32>
    %7 = arith.mulf %6, %6 : vector<16x32xf32>
    %cst_2 = arith.constant dense<0.000000e+00> : vector<16xf32>
    %8 = vector.multi_reduction <add>, %7, %cst_2 [1] : vector<16x32xf32> to vector<16xf32>
    %9 = vector.shape_cast %8 : vector<16xf32> to vector<16x1xf32>
    %cst_3 = arith.constant 0.0322580636 : f32
    %10 = vector.broadcast %cst_3 : f32 to vector<16x1xf32>
    %11 = arith.mulf %9, %10 : vector<16x1xf32>
    %12 = math.sqrt %11 : vector<16x1xf32>
    %c0_4 = arith.constant 0 : index
    %c0_5 = arith.constant 0 : index
    %13 = vector.load %arg2[%c0_4, %c0_5] : memref<1x32xf32, #tpu.memory_space<vmem>>, vector<1x32xf32>
    %cst_6 = arith.constant 1.000000e-07 : f32
    %14 = vector.broadcast %cst_6 : f32 to vector<16x1xf32>
    %15 = arith.addf %12, %14 : vector<16x1xf32>
    %16 = vector.broadcast %15 : vector<16x1xf32> to vector<16x32xf32>
    %17 = arith.divf %6, %16 : vector<16x32xf32>
    %18 = vector.broadcast %13 : vector<1x32xf32> to vector<16x32xf32>
    %19 = arith.mulf %18, %17 : vector<16x32xf32>
    %c0_7 = arith.constant 0 : index
    %c0_8 = arith.constant 0 : index
    %20 = vector.load %arg3[%c0_7, %c0_8] : memref<1x32xf32, #tpu.memory_space<vmem>>, vector<1x32xf32>
    %21 = vector.broadcast %20 : vector<1x32xf32> to vector<16x32xf32>
    %22 = arith.addf %19, %21 : vector<16x32xf32>
    %c0_9 = arith.constant 0 : index
    %c0_10 = arith.constant 0 : index
    %23 = vector.load %arg4[%c0_9, %c0_10] : memref<16x32xf32, #tpu.memory_space<vmem>>, vector<16x32xf32>
    tpu.vector_store %arg4[%c0_9, %c0_10], %22 {strides = array<i32>} : memref<16x32xf32, #tpu.memory_space<vmem>>, vector<16x32xf32>,
    return
  }
  func.func @transform_0(%arg0: i32) -> (i32, i32) {
    %c0_i32 = arith.constant 0 : i32
    %c0_i32_0 = arith.constant 0 : i32
    return %arg0, %c0_i32 : i32, i32
  }
  func.func @transform_1(%arg0: i32) -> (i32, i32) {
    %c0_i32 = arith.constant 0 : i32
    %c0_i32_0 = arith.constant 0 : i32
    %c0_i32_1 = arith.constant 0 : i32
    return %c0_i32, %c0_i32_0 : i32, i32
  }
  func.func @transform_2(%arg0: i32) -> (i32, i32) {
    %c0_i32 = arith.constant 0 : i32
    %c0_i32_0 = arith.constant 0 : i32
    %c0_i32_1 = arith.constant 0 : i32
    return %c0_i32, %c0_i32_0 : i32, i32
  }
  func.func @transform_3(%arg0: i32) -> (i32, i32) {
    %c0_i32 = arith.constant 0 : i32
    %c0_i32_0 = arith.constant 0 : i32
    return %arg0, %c0_i32 : i32, i32
  }
}

module attributes {stable_mosaic.version = 11 : i64} {
  func.func @_linear_kernel(%arg0: i32, %arg1: i32, %arg2: memref<16x32xf32, #tpu.memory_space<vmem>>, %arg3: memref<128x32xf32, #tpu.memory_space<vmem>>, %arg4: memref<1x128xf32, #tpu.memory_space<vmem>>, %arg5: memref<16x128xf32, #tpu.memory_space<vmem>>) attributes {dimension_semantics = [#tpu.dimension_semantics<parallel>, #tpu.dimension_semantics<parallel>], iteration_bounds = array<i64: 1, 1>, scalar_prefetch = 0 : i64, scratch_operands = 0 : i64, tpu.core_type = #tpu.core_type<tc>, window_params = [{transform_indices = @transform_0, window_bounds = array<i64: 16, 32>}, {transform_indices = @transform_1, window_bounds = array<i64: 128, 32>}, {transform_indices = @transform_2, window_bounds = array<i64: 1, 128>}, {transform_indices = @transform_3, window_bounds = array<i64: 16, 128>}]} {
    %c0 = arith.constant 0 : index
    %c0_0 = arith.constant 0 : index
    %0 = vector.load %arg2[%c0, %c0_0] : memref<16x32xf32, #tpu.memory_space<vmem>>, vector<16x32xf32>
    %c0_1 = arith.constant 0 : index
    %c0_2 = arith.constant 0 : index
    %1 = vector.load %arg3[%c0_1, %c0_2] : memref<128x32xf32, #tpu.memory_space<vmem>>, vector<128x32xf32>
    %cst = arith.constant dense<0.000000e+00> : vector<16x128xf32>
    %2 = tpu.matmul %0, %1, %cst {dimension_numbers = #tpu.dot_dimension_numbers<[1], [1], [0], [0], [0, 0, 1, 0], [], []>} : vector<16x32xf32>, vector<128x32xf32>, vector<16x128xf32> -> vector<16x128xf32>
    %c0_3 = arith.constant 0 : index
    %c0_4 = arith.constant 0 : index
    %3 = vector.load %arg4[%c0_3, %c0_4] : memref<1x128xf32, #tpu.memory_space<vmem>>, vector<1x128xf32>
    %4 = vector.broadcast %3 : vector<1x128xf32> to vector<16x128xf32>
    %5 = arith.addf %2, %4 : vector<16x128xf32>
    %c0_5 = arith.constant 0 : index
    %c0_6 = arith.constant 0 : index
    %6 = vector.load %arg5[%c0_5, %c0_6] : memref<16x128xf32, #tpu.memory_space<vmem>>, vector<16x128xf32>
    tpu.vector_store %arg5[%c0_5, %c0_6], %5 {strides = array<i32>} : memref<16x128xf32, #tpu.memory_space<vmem>>, vector<16x128xf32>,
    return
  }
  func.func @transform_0(%arg0: i32, %arg1: i32) -> (i32, i32) {
    %c0_i32 = arith.constant 0 : i32
    %c0_i32_0 = arith.constant 0 : i32
    return %arg1, %c0_i32 : i32, i32
  }
  func.func @transform_1(%arg0: i32, %arg1: i32) -> (i32, i32) {
    %c0_i32 = arith.constant 0 : i32
    %c0_i32_0 = arith.constant 0 : i32
    return %arg0, %c0_i32 : i32, i32
  }
  func.func @transform_2(%arg0: i32, %arg1: i32) -> (i32, i32) {
    %c0_i32 = arith.constant 0 : i32
    %c0_i32_0 = arith.constant 0 : i32
    return %c0_i32, %arg0 : i32, i32
  }
  func.func @transform_3(%arg0: i32, %arg1: i32) -> (i32, i32) {
    %c0_i32 = arith.constant 0 : i32
    return %arg1, %arg0 : i32, i32
  }
}

module attributes {stable_mosaic.version = 11 : i64} {
  func.func @_attention_kernel(%arg0: i32, %arg1: i32, %arg2: memref<1x1x8x8xf32, #tpu.memory_space<vmem>>, %arg3: memref<1x1x8x8xf32, #tpu.memory_space<vmem>>, %arg4: memref<1x1x8x8xf32, #tpu.memory_space<vmem>>, %arg5: memref<1x1x8x8xf32, #tpu.memory_space<vmem>>) attributes {dimension_semantics = [#tpu.dimension_semantics<parallel>, #tpu.dimension_semantics<parallel>], iteration_bounds = array<i64: 2, 4>, scalar_prefetch = 0 : i64, scratch_operands = 0 : i64, tpu.core_type = #tpu.core_type<tc>, window_params = [{transform_indices = @transform_0, window_bounds = array<i64: 1, 1, 8, 8>}, {transform_indices = @transform_1, window_bounds = array<i64: 1, 1, 8, 8>}, {transform_indices = @transform_2, window_bounds = array<i64: 1, 1, 8, 8>}, {transform_indices = @transform_3, window_bounds = array<i64: 1, 1, 8, 8>}]} {
    %c0 = arith.constant 0 : index
    %c0_0 = arith.constant 0 : index
    %c0_1 = arith.constant 0 : index
    %c0_2 = arith.constant 0 : index
    %0 = vector.load %arg2[%c0, %c0_0, %c0_1, %c0_2] : memref<1x1x8x8xf32, #tpu.memory_space<vmem>>, vector<1x1x8x8xf32>
    %1 = vector.shape_cast %0 : vector<1x1x8x8xf32> to vector<8x8xf32>
    %c0_3 = arith.constant 0 : index
    %c0_4 = arith.constant 0 : index
    %c0_5 = arith.constant 0 : index
    %c0_6 = arith.constant 0 : index
    %2 = vector.load %arg3[%c0_3, %c0_4, %c0_5, %c0_6] : memref<1x1x8x8xf32, #tpu.memory_space<vmem>>, vector<1x1x8x8xf32>
    %3 = vector.shape_cast %2 : vector<1x1x8x8xf32> to vector<8x8xf32>
    %c0_7 = arith.constant 0 : index
    %c0_8 = arith.constant 0 : index
    %c0_9 = arith.constant 0 : index
    %c0_10 = arith.constant 0 : index
    %4 = vector.load %arg4[%c0_7, %c0_8, %c0_9, %c0_10] : memref<1x1x8x8xf32, #tpu.memory_space<vmem>>, vector<1x1x8x8xf32>
    %5 = vector.shape_cast %4 : vector<1x1x8x8xf32> to vector<8x8xf32>
    %cst = arith.constant dense<0.000000e+00> : vector<8x8xf32>
    %6 = tpu.matmul %1, %3, %cst {dimension_numbers = #tpu.dot_dimension_numbers<[1], [1], [0], [0], [0, 0, 1, 0], [], []>} : vector<8x8xf32>, vector<8x8xf32>, vector<8x8xf32> -> vector<8x8xf32>
    %cst_11 = arith.constant 0.353553385 : f32
    %7 = vector.broadcast %cst_11 : f32 to vector<8x8xf32>
    %8 = arith.mulf %6, %7 : vector<8x8xf32>
    %9 = tpu.iota {dimensions = array<i32: 0>} : vector<8x8xi32>
    %10 = tpu.iota {dimensions = array<i32: 1>} : vector<8x8xi32>
    %11 = arith.cmpi sle, %10, %9 : vector<8x8xi32>
    %cst_12 = arith.constant -1.000000e+30 : f32
    %12 = vector.broadcast %cst_12 : f32 to vector<8x8xf32>
    %13 = arith.select %11, %8, %12 : vector<8x8xi1>, vector<8x8xf32>
    %cst_13 = arith.constant dense<0xFF800000> : vector<8xf32>
    %14 = vector.multi_reduction <maximumf>, %13, %cst_13 [1] : vector<8x8xf32> to vector<8xf32>
    %15 = vector.shape_cast %14 : vector<8xf32> to vector<8x1xf32>
    %16 = vector.broadcast %15 : vector<8x1xf32> to vector<8x8xf32>
    %17 = arith.subf %13, %16 : vector<8x8xf32>
    %18 = math.exp %17 : vector<8x8xf32>
    %cst_14 = arith.constant dense<0.000000e+00> : vector<8xf32>
    %19 = vector.multi_reduction <add>, %18, %cst_14 [1] : vector<8x8xf32> to vector<8xf32>
    %20 = vector.shape_cast %19 : vector<8xf32> to vector<8x1xf32>
    %21 = vector.broadcast %20 : vector<8x1xf32> to vector<8x8xf32>
    %22 = arith.divf %18, %21 : vector<8x8xf32>
    %cst_15 = arith.constant dense<0.000000e+00> : vector<8x8xf32>
    %23 = tpu.matmul %22, %5, %cst_15 {dimension_numbers = #tpu.dot_dimension_numbers<[1], [0], [0], [1], [0, 0, 1, 1], [], []>} : vector<8x8xf32>, vector<8x8xf32>, vector<8x8xf32> -> vector<8x8xf32>
    %24 = vector.shape_cast %23 : vector<8x8xf32> to vector<1x1x8x8xf32>
    %c0_16 = arith.constant 0 : index
    %c0_17 = arith.constant 0 : index
    %c0_18 = arith.constant 0 : index
    %c0_19 = arith.constant 0 : index
    %25 = vector.load %arg5[%c0_16, %c0_17, %c0_18, %c0_19] : memref<1x1x8x8xf32, #tpu.memory_space<vmem>>, vector<1x1x8x8xf32>
    tpu.vector_store %arg5[%c0_16, %c0_17, %c0_18, %c0_19], %24 {strides = array<i32>} : memref<1x1x8x8xf32, #tpu.memory_space<vmem>>, vector<1x1x8x8xf32>,
    return
  }
  func.func @transform_0(%arg0: i32, %arg1: i32) -> (i32, i32, i32, i32) {
    %c0_i32 = arith.constant 0 : i32
    %c0_i32_0 = arith.constant 0 : i32
    %c0_i32_1 = arith.constant 0 : i32
    return %arg0, %arg1, %c0_i32, %c0_i32_0 : i32, i32, i32, i32
  }
  func.func @transform_1(%arg0: i32, %arg1: i32) -> (i32, i32, i32, i32) {
    %c0_i32 = arith.constant 0 : i32
    %c0_i32_0 = arith.constant 0 : i32
    %c0_i32_1 = arith.constant 0 : i32
    return %arg0, %arg1, %c0_i32, %c0_i32_0 : i32, i32, i32, i32
  }
  func.func @transform_2(%arg0: i32, %arg1: i32) -> (i32, i32, i32, i32) {
    %c0_i32 = arith.constant 0 : i32
    %c0_i32_0 = arith.constant 0 : i32
    %c0_i32_1 = arith.constant 0 : i32
    return %arg0, %arg1, %c0_i32, %c0_i32_0 : i32, i32, i32, i32
  }
  func.func @transform_3(%arg0: i32, %arg1: i32) -> (i32, i32, i32, i32) {
    %c0_i32 = arith.constant 0 : i32
    %c0_i32_0 = arith.constant 0 : i32
    %c0_i32_1 = arith.constant 0 : i32
    return %arg0, %arg1, %c0_i32, %c0_i32_0 : i32, i32, i32, i32
  }
}

module attributes {stable_mosaic.version = 11 : i64} {
  func.func @_linear_kernel(%arg0: i32, %arg1: i32, %arg2: memref<16x128xf32, #tpu.memory_space<vmem>>, %arg3: memref<128x128xf32, #tpu.memory_space<vmem>>, %arg4: memref<1x128xf32, #tpu.memory_space<vmem>>, %arg5: memref<16x128xf32, #tpu.memory_space<vmem>>) attributes {dimension_semantics = [#tpu.dimension_semantics<parallel>, #tpu.dimension_semantics<parallel>], iteration_bounds = array<i64: 1, 1>, scalar_prefetch = 0 : i64, scratch_operands = 0 : i64, tpu.core_type = #tpu.core_type<tc>, window_params = [{transform_indices = @transform_0, window_bounds = array<i64: 16, 128>}, {transform_indices = @transform_1, window_bounds = array<i64: 128, 128>}, {transform_indices = @transform_2, window_bounds = array<i64: 1, 128>}, {transform_indices = @transform_3, window_bounds = array<i64: 16, 128>}]} {
    %c0 = arith.constant 0 : index
    %c0_0 = arith.constant 0 : index
    %0 = vector.load %arg2[%c0, %c0_0] : memref<16x128xf32, #tpu.memory_space<vmem>>, vector<16x128xf32>
    %c0_1 = arith.constant 0 : index
    %c0_2 = arith.constant 0 : index
    %1 = vector.load %arg3[%c0_1, %c0_2] : memref<128x128xf32, #tpu.memory_space<vmem>>, vector<128x128xf32>
    %cst = arith.constant dense<0.000000e+00> : vector<16x128xf32>
    %2 = tpu.matmul %0, %1, %cst {dimension_numbers = #tpu.dot_dimension_numbers<[1], [1], [0], [0], [0, 0, 1, 0], [], []>} : vector<16x128xf32>, vector<128x128xf32>, vector<16x128xf32> -> vector<16x128xf32>
    %c0_3 = arith.constant 0 : index
    %c0_4 = arith.constant 0 : index
    %3 = vector.load %arg4[%c0_3, %c0_4] : memref<1x128xf32, #tpu.memory_space<vmem>>, vector<1x128xf32>
    %4 = vector.broadcast %3 : vector<1x128xf32> to vector<16x128xf32>
    %5 = arith.addf %2, %4 : vector<16x128xf32>
    %c0_5 = arith.constant 0 : index
    %c0_6 = arith.constant 0 : index
    %6 = vector.load %arg5[%c0_5, %c0_6] : memref<16x128xf32, #tpu.memory_space<vmem>>, vector<16x128xf32>
    tpu.vector_store %arg5[%c0_5, %c0_6], %5 {strides = array<i32>} : memref<16x128xf32, #tpu.memory_space<vmem>>, vector<16x128xf32>,
    return
  }
  func.func @transform_0(%arg0: i32, %arg1: i32) -> (i32, i32) {
    %c0_i32 = arith.constant 0 : i32
    %c0_i32_0 = arith.constant 0 : i32
    return %arg1, %c0_i32 : i32, i32
  }
  func.func @transform_1(%arg0: i32, %arg1: i32) -> (i32, i32) {
    %c0_i32 = arith.constant 0 : i32
    %c0_i32_0 = arith.constant 0 : i32
    return %arg0, %c0_i32 : i32, i32
  }
  func.func @transform_2(%arg0: i32, %arg1: i32) -> (i32, i32) {
    %c0_i32 = arith.constant 0 : i32
    %c0_i32_0 = arith.constant 0 : i32
    return %c0_i32, %arg0 : i32, i32
  }
  func.func @transform_3(%arg0: i32, %arg1: i32) -> (i32, i32) {
    %c0_i32 = arith.constant 0 : i32
    return %arg1, %arg0 : i32, i32
  }
}

module attributes {stable_mosaic.version = 11 : i64} {
  func.func @_linear_kernel(%arg0: i32, %arg1: i32, %arg2: memref<16x32xf32, #tpu.memory_space<vmem>>, %arg3: memref<128x32xf32, #tpu.memory_space<vmem>>, %arg4: memref<1x128xf32, #tpu.memory_space<vmem>>, %arg5: memref<16x128xf32, #tpu.memory_space<vmem>>) attributes {dimension_semantics = [#tpu.dimension_semantics<parallel>, #tpu.dimension_semantics<parallel>], iteration_bounds = array<i64: 1, 1>, scalar_prefetch = 0 : i64, scratch_operands = 0 : i64, tpu.core_type = #tpu.core_type<tc>, window_params = [{transform_indices = @transform_0, window_bounds = array<i64: 16, 32>}, {transform_indices = @transform_1, window_bounds = array<i64: 128, 32>}, {transform_indices = @transform_2, window_bounds = array<i64: 1, 128>}, {transform_indices = @transform_3, window_bounds = array<i64: 16, 128>}]} {
    %c0 = arith.constant 0 : index
    %c0_0 = arith.constant 0 : index
    %0 = vector.load %arg2[%c0, %c0_0] : memref<16x32xf32, #tpu.memory_space<vmem>>, vector<16x32xf32>
    %c0_1 = arith.constant 0 : index
    %c0_2 = arith.constant 0 : index
    %1 = vector.load %arg3[%c0_1, %c0_2] : memref<128x32xf32, #tpu.memory_space<vmem>>, vector<128x32xf32>
    %cst = arith.constant dense<0.000000e+00> : vector<16x128xf32>
    %2 = tpu.matmul %0, %1, %cst {dimension_numbers = #tpu.dot_dimension_numbers<[1], [1], [0], [0], [0, 0, 1, 0], [], []>} : vector<16x32xf32>, vector<128x32xf32>, vector<16x128xf32> -> vector<16x128xf32>
    %c0_3 = arith.constant 0 : index
    %c0_4 = arith.constant 0 : index
    %3 = vector.load %arg4[%c0_3, %c0_4] : memref<1x128xf32, #tpu.memory_space<vmem>>, vector<1x128xf32>
    %4 = vector.broadcast %3 : vector<1x128xf32> to vector<16x128xf32>
    %5 = arith.addf %2, %4 : vector<16x128xf32>
    %cst_5 = arith.constant 5.000000e-01 : f32
    %6 = vector.broadcast %cst_5 : f32 to vector<16x128xf32>
    %7 = arith.mulf %6, %5 : vector<16x128xf32>
    %cst_6 = arith.constant 4.471500e-02 : f32
    %8 = vector.broadcast %cst_6 : f32 to vector<16x128xf32>
    %9 = arith.mulf %8, %5 : vector<16x128xf32>
    %10 = arith.mulf %9, %5 : vector<16x128xf32>
    %11 = arith.mulf %10, %5 : vector<16x128xf32>
    %12 = arith.addf %5, %11 : vector<16x128xf32>
    %cst_7 = arith.constant 0.797884583 : f32
    %13 = vector.broadcast %cst_7 : f32 to vector<16x128xf32>
    %14 = arith.mulf %13, %12 : vector<16x128xf32>
    %15 = math.tanh %14 : vector<16x128xf32>
    %cst_8 = arith.constant 1.000000e+00 : f32
    %16 = vector.broadcast %cst_8 : f32 to vector<16x128xf32>
    %17 = arith.addf %16, %15 : vector<16x128xf32>
    %18 = arith.mulf %7, %17 : vector<16x128xf32>
    %c0_9 = arith.constant 0 : index
    %c0_10 = arith.constant 0 : index
    %19 = vector.load %arg5[%c0_9, %c0_10] : memref<16x128xf32, #tpu.memory_space<vmem>>, vector<16x128xf32>
    tpu.vector_store %arg5[%c0_9, %c0_10], %18 {strides = array<i32>} : memref<16x128xf32, #tpu.memory_space<vmem>>, vector<16x128xf32>,
    return
  }
  func.func @transform_0(%arg0: i32, %arg1: i32) -> (i32, i32) {
    %c0_i32 = arith.constant 0 : i32
    %c0_i32_0 = arith.constant 0 : i32
    return %arg1, %c0_i32 : i32, i32
  }
  func.func @transform_1(%arg0: i32, %arg1: i32) -> (i32, i32) {
    %c0_i32 = arith.constant 0 : i32
    %c0_i32_0 = arith.constant 0 : i32
    return %arg0, %c0_i32 : i32, i32
  }
  func.func @transform_2(%arg0: i32, %arg1: i32) -> (i32, i32) {
    %c0_i32 = arith.constant 0 : i32
    %c0_i32_0 = arith.constant 0 : i32
    return %c0_i32, %arg0 : i32, i32
  }
  func.func @transform_3(%arg0: i32, %arg1: i32) -> (i32, i32) {
    %c0_i32 = arith.constant 0 : i32
    return %arg1, %arg0 : i32, i32
  }
}

module attributes {stable_mosaic.version = 11 : i64} {
  func.func @_linear_kernel(%arg0: i32, %arg1: i32, %arg2: memref<16x32xbf16, #tpu.memory_space<vmem>>, %arg3: memref<128x32xbf16, #tpu.memory_space<vmem>>, %arg4: memref<1x128xf32, #tpu.memory_space<vmem>>, %arg5: memref<16x128xf32, #tpu.memory_space<vmem>>) attributes {dimension_semantics = [#tpu.dimension_semantics<parallel>, #tpu.dimension_semantics<parallel>], iteration_bounds = array<i64: 1, 1>, scalar_prefetch = 0 : i64, scratch_operands = 0 : i64, tpu.core_type = #tpu.core_type<tc>, window_params = [{transform_indices = @transform_0, window_bounds = array<i64: 16, 32>}, {transform_indices = @transform_1, window_bounds = array<i64: 128, 32>}, {transform_indices = @transform_2, window_bounds = array<i64: 1, 128>}, {transform_indices = @transform_3, window_bounds = array<i64: 16, 128>}]} {
    %c0 = arith.constant 0 : index
    %c0_0 = arith.constant 0 : index
    %0 = vector.load %arg2[%c0, %c0_0] : memref<16x32xbf16, #tpu.memory_space<vmem>>, vector<16x32xbf16>
    %c0_1 = arith.constant 0 : index
    %c0_2 = arith.constant 0 : index
    %1 = vector.load %arg3[%c0_1, %c0_2] : memref<128x32xbf16, #tpu.memory_space<vmem>>, vector<128x32xbf16>
    %cst = arith.constant dense<0.000000e+00> : vector<16x128xf32>
    %2 = tpu.matmul %0, %1, %cst {dimension_numbers = #tpu.dot_dimension_numbers<[1], [1], [0], [0], [0, 0, 1, 0], [], []>} : vector<16x32xbf16>, vector<128x32xbf16>, vector<16x128xf32> -> vector<16x128xf32>
    %c0_3 = arith.constant 0 : index
    %c0_4 = arith.constant 0 : index
    %3 = vector.load %arg4[%c0_3, %c0_4] : memref<1x128xf32, #tpu.memory_space<vmem>>, vector<1x128xf32>
    %4 = vector.broadcast %3 : vector<1x128xf32> to vector<16x128xf32>
    %5 = arith.addf %2, %4 : vector<16x128xf32>
    %c0_5 = arith.constant 0 : index
    %c0_6 = arith.constant 0 : index
    %6 = vector.load %arg5[%c0_5, %c0_6] : memref<16x128xf32, #tpu.memory_space<vmem>>, vector<16x128xf32>
    tpu.vector_store %arg5[%c0_5, %c0_6], %5 {strides = array<i32>} : memref<16x128xf32, #tpu.memory_space<vmem>>, vector<16x128xf32>,
    return
  }
  func.func @transform_0(%arg0: i32, %arg1: i32) -> (i32, i32) {
    %c0_i32 = arith.constant 0 : i32
    %c0_i32_0 = arith.constant 0 : i32
    return %arg1, %c0_i32 : i32, i32
  }
  func.func @transform_1(%arg0: i32, %arg1: i32) -> (i32, i32) {
    %c0_i32 = arith.constant 0 : i32
    %c0_i32_0 = arith.constant 0 : i32
    return %arg0, %c0_i32 : i32, i32
  }
  func.func @transform_2(%arg0: i32, %arg1: i32) -> (i32, i32) {
    %c0_i32 = arith.constant 0 : i32
    %c0_i32_0 = arith.constant 0 : i32
    return %c0_i32, %arg0 : i32, i32
  }
  func.func @transform_3(%arg0: i32, %arg1: i32) -> (i32, i32) {
    %c0_i32 = arith.constant 0 : i32
    return %arg1, %arg0 : i32, i32
  }
}

</mosaic_0001>

<bundles_post_ra>
// kernel: gpt2_forward.16
= control target key start
LH: loop header
LB: loop body
LE: loop exit
PB: predicated region body
PF: predicated region fallthrough
CT: control target
= control target key end

     0   :  { %vm16_vm0 = vcmask 261120   ;;  %s136_s0 = inlined_call_operand.vmem [shape: f32[16,32], index: 0, kind: input, shape index: {}]   ;;  %s137_s1 = inlined_call_operand.vmem [shape: f32[1,32], index: 1, kind: input, shape index: {}]   ;;  %s138_s2 = inlined_call_operand.vmem [shape: f32[1,32], index: 2, kind: input, shape index: {}]   ;;  %s139_s3 = inlined_call_operand.vmem [shape: f32[16,32], index: 3, kind: output, shape index: {}]  }
   0x1   :  { %v14_v0 = vld [vmem:[%s136_s0] sm:$0xff]  ;;  %v15_v1 = vld [vmem:[%s136_s0 + $0x8] sm:$0xff] }
   0x2   :  { %v17_v2 = vsel %vm16_vm0, %v14_v0, 0.0  ;;  %v20_v3 = vsel %vm16_vm0, %v15_v1, 0.0  ;;  %v82_v31 = vld [vmem:[%s137_s1] ss:$0 sm:$0xff] }
   0x3   :  { %18 = vadd.xlane.f32.xlu0 %v17_v2  ;;  %v83_v33 = vld [vmem:[%s138_s2] ss:$0 sm:$0xff] }
   0x7   :  { %21 = vadd.xlane.f32.xlu0 %v20_v3 }
  0x90   :  { %v19_v4 = vpop.xlane.xlu0 %18 }
  0x91   :  { %v24_v5 = vmul.f32 0.03125, %v19_v4 }
  0x93   :  { %v26_v6 = vsub.f32 %v14_v0, %v24_v5 }
  0x94   :  { %v22_v7 = vpop.xlane.xlu0 %21 }
  0x95   :  { %v25_v8 = vmul.f32 0.03125, %v22_v7  ;;  %v28_v9 = vmul.f32 %v26_v6, %v26_v6 }
  0x97   :  { %v27_v10 = vsub.f32 %v15_v1, %v25_v8  ;;  %v30_v11 = vsel %vm16_vm0, %v28_v9, 0.0 }
  0x98   :  { %31 = vadd.xlane.f32.xlu1 %v30_v11 }
  0x99   :  { %v29_v12 = vmul.f32 %v27_v10, %v27_v10 }
  0x9b   :  { %v33_v13 = vsel %vm16_vm0, %v29_v12, 0.0 }
  0x9c   :  { %34 = vadd.xlane.f32.xlu1 %v33_v13 }
 0x125   :  { %v32_v14 = vpop.xlane.xlu1 %31 }
 0x126   :  { %v36_v15 = vmul.f32 0.032258064, %v32_v14 }
 0x128   :  { %84 = vrsqrt.f32 %v36_v15  ;;  %vm40_vm1 = vcmp.eq.f32.partialorder %v36_v15, inf  ;;  %v43_v20 = vand.u32 2147483648, %v36_v15  ;;  %vm42_vm2 = vcmp.eq.f32.partialorder %v36_v15, 0.0 }
 0x129   :  { %v35_v16 = vpop.xlane.xlu1 %34 }
 0x12a   :  { %v37_v17 = vmul.f32 0.032258064, %v35_v16 }
 0x12c   :  { %86 = vrsqrt.f32 %v37_v17  ;;  %vm47_vm3 = vcmp.eq.f32.partialorder %v37_v17, inf  ;;  %v50_v26 = vand.u32 2147483648, %v37_v17  ;;  %vm49_vm4 = vcmp.eq.f32.partialorder %v37_v17, 0.0 }
 0x132   :  { %v85_v18 = vpop.eup %84 }
 0x133   :  { %v39_v19 = vmul.f32 %v85_v18, %v36_v15 }
 0x135   :  { %v41_v21 = vsel %vm40_vm1, %v36_v15, %v39_v19 }
 0x136   :  { %v87_v22 = vpop.eup %86  ;;  %v44_v23 = vsel %vm42_vm2, %v43_v20, %v41_v21 }
 0x137   :  { %v53_v24 = vadd.f32 1e-07, %v44_v23  ;;  %v46_v25 = vmul.f32 %v87_v22, %v37_v17 }
 0x139   :  { %88 = vrcp.f32 %v53_v24  ;;  %v48_v27 = vsel %vm47_vm3, %v37_v17, %v46_v25 }
 0x13a   :  { %v51_v28 = vsel %vm49_vm4, %v50_v26, %v48_v27 }
 0x13b   :  { %v54_v29 = vadd.f32 1e-07, %v51_v28 }
 0x13d   :  { %90 = vrcp.f32 %v54_v29 }
 0x143   :  { %v89_v30 = vpop.eup %88 }
 0x144   :  { %v56_v32 = vmul.f32 %v89_v30, %v26_v6 }
 0x146   :  { %v65_v34 = vmul.f32 %v82_v31, %v56_v32 }
 0x147   :  { %v91_v35 = vpop.eup %90 }
 0x148   :  { %v74_v36 = vadd.f32 %v83_v33, %v65_v34  ;;  %v58_v37 = vmul.f32 %v91_v35, %v27_v10 }
 0x14a   :  { %76 = vst.msk [vmem:[%s139_s3] sm:$0xff] %vm16_vm0, %v74_v36  ;;  %v66_v38 = vmul.f32 %v82_v31, %v58_v37 }
 0x14c   :  { %v75_v39 = vadd.f32 %v83_v33, %v66_v38 }
 0x14e   :  { %77 = vst.msk [vmem:[%s139_s3 + $0x8] sm:$0xff] %vm16_vm0, %v75_v39 }

// kernel: gpt2_forward.17
= control target key start
LH: loop header
LB: loop body
LE: loop exit
PB: predicated region body
PF: predicated region fallthrough
CT: control target
= control target key end

     0   :  { %vm39_vm0 = vcmask 261120   ;;  %s418_s1 = inlined_call_operand.vmem [shape: f32[128,32], index: 1, kind: input, shape index: {}]   ;;  %s419_s0 = inlined_call_operand.vmem [shape: f32[16,32], index: 0, kind: input, shape index: {}]   ;;  %s420_s2 = inlined_call_operand.vmem [shape: f32[1,128], index: 2, kind: input, shape index: {}]   ;;  %s421_s3 = inlined_call_operand.vmem [shape: f32[16,128], index: 3, kind: output, shape index: {}]  }
   0x1   :  { %v16_v0 = vld [vmem:[%s418_s1] sm:$0xff]  ;;  %v17_v1 = vld [vmem:[%s418_s1 + $0x8] sm:$0xff]  ;;  %vm323_vm1 = vmpackc.low %vm39_vm0, %vm39_vm0 }
   0x2   :  { %v247_v3 = vpack.c.bf16 %v17_v1, %v16_v0  ;;  %v18_v4 = vld [vmem:[%s418_s1 + $0x10] sm:$0xff]  ;;  %v19_v5 = vld [vmem:[%s418_s1 + $0x18] sm:$0xff]  ;;  %v14_v7 = vld [vmem:[%s419_s0] sm:$0xff] }
   0x3   :  { %v253_v6 = vpack.c.bf16 %v19_v5, %v18_v4  ;;  %v20_v8 = vld [vmem:[%s418_s1 + $0x20] sm:$0xff]  ;;  %v21_v9 = vld [vmem:[%s418_s1 + $0x28] sm:$0xff]  ;;  %244 = vmatprep.mubr.msk.f32.mxu0 %vm39_vm0, %v14_v7  ;;  %v22_v11 = vld [vmem:[%s418_s1 + $0x30] sm:$0xff] }
   0x4   :  { %249 = vmatprep.subr.msk.bf16.mxu0 %vm323_vm1, %v247_v3  ;;  %v259_v10 = vpack.c.bf16 %v21_v9, %v20_v8  ;;  %v23_v12 = vld [vmem:[%s418_s1 + $0x38] sm:$0xff]  ;;  %v24_v14 = vld [vmem:[%s418_s1 + $0x40] sm:$0xff]  ;;  %v25_v15 = vld [vmem:[%s418_s1 + $0x48] sm:$0xff] }
   0x5   :  { %252 = vmatpush3.bf16.xpose.msk.msra.mxu0 %vm323_vm1, %v247_v3  ;;  %v265_v13 = vpack.c.bf16 %v23_v12, %v22_v11  ;;  %v271_v16 = vpack.c.bf16 %v25_v15, %v24_v14  ;;  %v26_v17 = vld [vmem:[%s418_s1 + $0x50] sm:$0xff]  ;;  %v27_v18 = vld [vmem:[%s418_s1 + $0x58] sm:$0xff]  ;;  %v28_v20 = vld [vmem:[%s418_s1 + $0x60] sm:$0xff] }
   0x6   :  { %255 = vmatprep.subr.msk.bf16.mxu0 %vm323_vm1, %v253_v6  ;;  %v277_v19 = vpack.c.bf16 %v27_v18, %v26_v17  ;;  %v29_v21 = vld [vmem:[%s418_s1 + $0x68] sm:$0xff]  ;;  %v30_v23 = vld [vmem:[%s418_s1 + $0x70] sm:$0xff]  ;;  %v31_v24 = vld [vmem:[%s418_s1 + $0x78] sm:$0xff] }
   0x7   :  { %v283_v22 = vpack.c.bf16 %v29_v21, %v28_v20  ;;  %v289_v25 = vpack.c.bf16 %v31_v24, %v30_v23  ;;  %v15_v26 = vld [vmem:[%s419_s0 + $0x8] sm:$0xff]  ;;  %v175_v27 = vld [vmem:[%s420_s2] ss:$0 sm:$0xff] }
   0xd   :  { %258 = vmatpush3.bf16.xpose.msk.msra.mxu0 %vm323_vm1, %v253_v6 }
   0xe   :  { %261 = vmatprep.subr.msk.bf16.mxu0 %vm323_vm1, %v259_v10 }
  0x15   :  { %264 = vmatpush3.bf16.xpose.msk.msra.mxu0 %vm323_vm1, %v259_v10 }
  0x16   :  { %267 = vmatprep.subr.msk.bf16.mxu0 %vm323_vm1, %v265_v13 }
  0x1d   :  { %270 = vmatpush3.bf16.xpose.msk.msra.mxu0 %vm323_vm1, %v265_v13 }
  0x1e   :  { %273 = vmatprep.subr.msk.bf16.mxu0 %vm323_vm1, %v271_v16 }
  0x25   :  { %276 = vmatpush3.bf16.xpose.msk.msra.mxu0 %vm323_vm1, %v271_v16 }
  0x26   :  { %279 = vmatprep.subr.msk.bf16.mxu0 %vm323_vm1, %v277_v19 }
  0x2d   :  { %282 = vmatpush3.bf16.xpose.msk.msra.mxu0 %vm323_vm1, %v277_v19 }
  0x2e   :  { %285 = vmatprep.subr.msk.bf16.mxu0 %vm323_vm1, %v283_v22 }
  0x35   :  { %288 = vmatpush3.bf16.xpose.msk.msra.mxu0 %vm323_vm1, %v283_v22 }
  0x36   :  { %291 = vmatprep.subr.msk.bf16.mxu0 %vm323_vm1, %v289_v25 }
  0x3d   :  { %294 = vmatpush3.bf16.xpose.msk.msra.mxu0 %vm323_vm1, %v289_v25 }
  0x44   :  { %245 = vmatmul.mubr.msk.f32.vlgmr.msra.gmra.mrb[0].mxu0 %vm39_vm0, %v15_v26 }
 0x117   :  { %v246_v28 = vpop.f32.mrb[0].mxu0 }
 0x118   :  { %v166_v29 = vadd.f32 %v246_v28, %v175_v27  ;;  %v160_v30 = vpop.f32.mrb[1].mxu0 }
 0x119   :  { %v161_v31 = vadd.f32 %v175_v27, %v160_v30 }
 0x11a   :  { %170 = vst [vmem:[%s421_s3 + $0x8] sm:$0xff] %v166_v29 }
 0x11b   :  { %169 = vst [vmem:[%s421_s3] sm:$0xff] %v161_v31 }

// kernel: gpt2_forward.18
= control target key start
LH: loop header
LB: loop body
LE: loop exit
PB: predicated region body
PF: predicated region fallthrough
CT: control target
= control target key end

     0   :  { %s698_s12 = smov 0   ;;  %s700_s13 = smov 0   ;;  %s767_s0 = inlined_call_operand.vmem [shape: f32[2,4,8,8], index: 0, kind: input, shape index: {}]   ;;  %s768_s1 = inlined_call_operand.vmem [shape: f32[2,4,8,8], index: 1, kind: input, shape index: {}]   ;;  %s769_s2 = inlined_call_operand.vmem [shape: f32[2,4,8,8], index: 2, kind: input, shape index: {}]   ;;  %s770_s3 = inlined_call_operand.vmem [shape: f32[2,4,8,8], index: 3, kind: output, shape index: {}]  }
   0x1   :  { %s702_s14 = smov 0   ;;  %s704_s15 = smov 0  }
   0x2   :  { %s706_s16 = smov 0  }
   0x3 LB: > { %s22_s17 = sadd.s32 1, %s666_s14  ;;  %s25_s18 = sadd.s32 1, %s670_s15  ;;  %s674_s16 = sphi %s706_s16, %s13_s16   ;;  %s670_s15 = sphi %s704_s15, %s774_s15   ;;  %s666_s14 = sphi %s702_s14, %s773_s14   ;;  %s662_s13 = sphi %s700_s13, %s772_s13   ;;  %s658_s12 = sphi %s698_s12, %s771_s12  }
   0x4   : > { %p23_p0 = scmp.ge.s32.totalorder %s22_s17, 4  ;;  %p562_p1 = scmp.ge.s32.totalorder %s674_s16, 1 }
   0x5   : > { %p186_p2 = scmp.lt.s32.totalorder %s674_s16, 9 }
   0x6   : > { %s776_s17 = smov (%p23_p0, %s22_s17), 0  ;;  %s778_s18 = smov (!%p23_p0, %s25_s18), %s670_s15 }
   0x7   : > { %p187_p3 = pnand %p562_p1, %p186_p2  ;;  %p27_p4 = scmp.ge.s32.totalorder %s778_s18, 2 }
   0x8   : > { %p232_p5 = scmp.lt.s32.totalorder (!%p187_p3), %s662_s13, 1  ;;  %p234_p6 = scmp.lt.s32.totalorder (!%p187_p3), %s658_s12, 3  ;;  %v676_v0 = vmov (!%p187_p3), 0.0   ;;  %vm677_vm0 = vmmov (!%p187_p3), 0   ;;  %vm267_vm1 = vcmask (!%p187_p3), 64512   ;;  %v345_v3 = vlaneseq (!%p187_p3) }
   0x9   : > { %s780_s18 = smov (%p27_p4, %s778_s18), 0  ;;  %190 = sbr.rel (%p187_p3) target bundleno = 767 (0x2ff), region = 32 }
   0xa   : > { %580 = vmatprep.subr.mxu0 (!%p187_p3), %v676_v0  ;;  %582 = vmatprep.mubr.msk.f32.mxu0 (!%p187_p3), %vm677_vm0, %v676_v0  ;;  %v346_v4 = vshrl.u32 (!%p187_p3), %v345_v3, 7  ;;  %v348_v5 = vand.u32 (!%p187_p3), 127, %v345_v3 }
   0xb   : > { %585 = vmatprep.subr.mxu1 (!%p187_p3), %v676_v0  ;;  %587 = vmatprep.mubr.msk.f32.mxu1 (!%p187_p3), %vm677_vm0, %v676_v0 }
   0xc   : > { %vm349_vm2 = vcmp.le.s32.totalorder (!%p187_p3), %v348_v5, %v346_v4 }
  0x10   : > { %s782_s13 = smov (!%p232_p5, %s662_s13), 1  ;;  %s784_s12 = smov (!%p234_p6, %s658_s12), 3 }
  0x11   : > { %s563_s19 = sshll.u32 %s782_s13, 2 }
  0x12   : > { %s237_s20 = sadd.s32 %s563_s19, %s784_s12 }
  0x13   : > { %s728_s21 = sshll.u32 %s237_s20, 3 }
  0x14   : > { %s247_s24 = scalar_lea.vmem %s768_s1, %s728_s21  ;;  %s239_s27 = scalar_lea.vmem %s767_s0, %s728_s21 }
  0x15   : > { %v265_v1 = vld [vmem:[%s247_s24] sm:$0xff]  ;;  %s255_s30 = scalar_lea.vmem %s769_s2, %s728_s21  ;;  %s263_s6 = scalar_lea.vmem %s770_s3, %s728_s21 }
  0x16   : > { %581 = vmatpush3.xpose.msk.msra.mxu0 %vm267_vm1, %v265_v1  ;;  %v264_v2 = vld [vmem:[%s239_s27] sm:$0xff] }
  0x17   : > { %v266_v16 = vld [vmem:[%s255_s30] sm:$0xff] }
  0x18   : > { %586 = vmatpush3.msra.mxu1 %v266_v16 }
  0x19   : > { %583 = vmatmul.mubr.msk.f32.vlgmr.msra.gmra.mrb[0].mxu0 %vm267_vm1, %v264_v2 }
  0xec   : > { %v340_v6 = vpop.f32.mrb[0].mxu0 }
  0xed   : > { %v344_v7 = vmul.f32 0.35355338, %v340_v6  ;;  %v584_v8 = vpop.f32.mrb[1].mxu0 }
  0xef   : > { %v350_v9 = vsel %vm349_vm2, %v344_v7, -1e+30 }
  0xf0   : > { %v351_v10 = vsel %vm267_vm1, %v350_v9, -inf }
  0xf1   : > { %352 = vmax.xlane.f32.xlu0 %v351_v10 }
 0x17e   : > { %v353_v11 = vpop.xlane.xlu0 %352 }
 0x17f   : > { %v354_v12 = vsub.f32 %v350_v9, %v353_v11 }
 0x181   : > { %v355_v13 = vmul.f32 1.442695, %v354_v12 }
 0x183   : > { %632 = vpow2.f32 %v355_v13 }
 0x18d   : > { %v633_v14 = vpop.eup %632 }
 0x18e   : > { %v357_v15 = vsel %vm267_vm1, %v633_v14, 0.0 }
 0x18f   : > { %358 = vadd.xlane.f32.xlu0 %v357_v15 }
 0x21c   : > { %v359_v17 = vpop.xlane.xlu0 %358 }
 0x21d   : > { %634 = vrcp.f32 %v359_v17 }
 0x227   : > { %v635_v18 = vpop.eup %634 }
 0x228   : > { %v361_v19 = vmul.f32 %v635_v18, %v633_v14 }
 0x22a   : > { %588 = vmatmul.mubr.msk.f32.vlgmr.msra.gmra.mrb[0].mxu1 %vm267_vm1, %v361_v19 }
 0x2fd   : > { %v431_v20 = vpop.f32.mrb[0].mxu1 }
 0x2fe   : > { %435 = vst.msk [vmem:[%s263_s6] sm:$0xff] %vm267_vm1, %v431_v20  ;;  %v589_v21 = vpop.f32.mrb[1].mxu1 }
 0x2ff PF: > { %s13_s16 = sadd.s32 1, %s674_s16   ;;  %s771_s12 = smov %s666_s14 }
 0x300   : > { %p10_p7 = scmp.ge.s32.totalorder %s13_s16, 10   ;;  %s772_s13 = smov %s670_s15 }
 0x301   : > { %s773_s14 = smov %s776_s17  ;;  %s774_s15 = smov %s780_s18 }
 0x302   :  { %12 = sbr.rel (!%p10_p7) target bundleno = 3 (0x3), region = 68 }

// kernel: gpt2_forward.22
= control target key start
LH: loop header
LB: loop body
LE: loop exit
PB: predicated region body
PF: predicated region fallthrough
CT: control target
= control target key end

     0   :  { %s289_s1 = inlined_call_operand.vmem [shape: f32[128,128], index: 1, kind: input, shape index: {}]   ;;  %s290_s0 = inlined_call_operand.vmem [shape: f32[16,128], index: 0, kind: input, shape index: {}]   ;;  %s291_s2 = inlined_call_operand.vmem [shape: f32[1,128], index: 2, kind: input, shape index: {}]   ;;  %s292_s3 = inlined_call_operand.vmem [shape: f32[16,128], index: 3, kind: output, shape index: {}]  }
   0x1   :  { %v16_v0 = vld [vmem:[%s289_s1] sm:$0xff]  ;;  %v17_v1 = vld [vmem:[%s289_s1 + $0x8] sm:$0xff]  ;;  %v18_v2 = vld [vmem:[%s289_s1 + $0x10] sm:$0xff] }
   0x2   :  { %v174_v3 = vpack.c.bf16 %v17_v1, %v16_v0  ;;  %v19_v4 = vld [vmem:[%s289_s1 + $0x18] sm:$0xff]  ;;  %v14_v6 = vld [vmem:[%s290_s0] sm:$0xff]  ;;  %v21_v8 = vld [vmem:[%s289_s1 + $0x28] sm:$0xff] }
   0x3   :  { %v178_v5 = vpack.c.bf16 %v19_v4, %v18_v2  ;;  %v20_v7 = vld [vmem:[%s289_s1 + $0x20] sm:$0xff]  ;;  %171 = vmatprep.mubr.f32.mxu0 %v14_v6  ;;  %v22_v10 = vld [vmem:[%s289_s1 + $0x30] sm:$0xff]  ;;  %v23_v11 = vld [vmem:[%s289_s1 + $0x38] sm:$0xff] }
   0x4   :  { %175 = vmatprep.subr.bf16.mxu0 %v174_v3  ;;  %v182_v9 = vpack.c.bf16 %v21_v8, %v20_v7  ;;  %v186_v12 = vpack.c.bf16 %v23_v11, %v22_v10  ;;  %v24_v13 = vld [vmem:[%s289_s1 + $0x40] sm:$0xff]  ;;  %v25_v14 = vld [vmem:[%s289_s1 + $0x48] sm:$0xff]  ;;  %v26_v16 = vld [vmem:[%s289_s1 + $0x50] sm:$0xff] }
   0x5   :  { %177 = vmatpush3.bf16.xpose.msra.mxu0 %v174_v3  ;;  %v190_v15 = vpack.c.bf16 %v25_v14, %v24_v13  ;;  %v27_v17 = vld [vmem:[%s289_s1 + $0x58] sm:$0xff]  ;;  %v28_v19 = vld [vmem:[%s289_s1 + $0x60] sm:$0xff]  ;;  %v29_v20 = vld [vmem:[%s289_s1 + $0x68] sm:$0xff] }
   0x6   :  { %179 = vmatprep.subr.bf16.mxu0 %v178_v5  ;;  %v194_v18 = vpack.c.bf16 %v27_v17, %v26_v16  ;;  %v198_v21 = vpack.c.bf16 %v29_v20, %v28_v19  ;;  %v30_v22 = vld [vmem:[%s289_s1 + $0x70] sm:$0xff]  ;;  %v31_v23 = vld [vmem:[%s289_s1 + $0x78] sm:$0xff]  ;;  %v15_v25 = vld [vmem:[%s290_s0 + $0x8] sm:$0xff] }
   0x7   :  { %v202_v24 = vpack.c.bf16 %v31_v23, %v30_v22  ;;  %v120_v26 = vld [vmem:[%s291_s2] ss:$0 sm:$0xff] }
   0xd   :  { %181 = vmatpush3.bf16.xpose.msra.mxu0 %v178_v5 }
   0xe   :  { %183 = vmatprep.subr.bf16.mxu0 %v182_v9 }
  0x15   :  { %185 = vmatpush3.bf16.xpose.msra.mxu0 %v182_v9 }
  0x16   :  { %187 = vmatprep.subr.bf16.mxu0 %v186_v12 }
  0x1d   :  { %189 = vmatpush3.bf16.xpose.msra.mxu0 %v186_v12 }
  0x1e   :  { %191 = vmatprep.subr.bf16.mxu0 %v190_v15 }
  0x25   :  { %193 = vmatpush3.bf16.xpose.msra.mxu0 %v190_v15 }
  0x26   :  { %195 = vmatprep.subr.bf16.mxu0 %v194_v18 }
  0x2d   :  { %197 = vmatpush3.bf16.xpose.msra.mxu0 %v194_v18 }
  0x2e   :  { %199 = vmatprep.subr.bf16.mxu0 %v198_v21 }
  0x35   :  { %201 = vmatpush3.bf16.xpose.msra.mxu0 %v198_v21 }
  0x36   :  { %203 = vmatprep.subr.bf16.mxu0 %v202_v24 }
  0x3d   :  { %205 = vmatpush3.bf16.xpose.msra.mxu0 %v202_v24 }
  0x44   :  { %172 = vmatmul.mubr.f32.vlgmr.msra.gmra.mrb[0].mxu0 %v15_v25 }
 0x117   :  { %v173_v27 = vpop.f32.mrb[0].mxu0 }
 0x118   :  { %v111_v28 = vadd.f32 %v173_v27, %v120_v26  ;;  %v105_v29 = vpop.f32.mrb[1].mxu0 }
 0x119   :  { %v106_v30 = vadd.f32 %v120_v26, %v105_v29 }
 0x11a   :  { %115 = vst [vmem:[%s292_s3 + $0x8] sm:$0xff] %v111_v28 }
 0x11b   :  { %114 = vst [vmem:[%s292_s3] sm:$0xff] %v106_v30 }

// kernel: gpt2_forward.21
= control target key start
LH: loop header
LB: loop body
LE: loop exit
PB: predicated region body
PF: predicated region fallthrough
CT: control target
= control target key end

     0   :  { %vm39_vm0 = vcmask 261120   ;;  %s440_s1 = inlined_call_operand.vmem [shape: f32[128,32], index: 1, kind: input, shape index: {}]   ;;  %s441_s0 = inlined_call_operand.vmem [shape: f32[16,32], index: 0, kind: input, shape index: {}]   ;;  %s442_s2 = inlined_call_operand.vmem [shape: f32[1,128], index: 2, kind: input, shape index: {}]   ;;  %s443_s3 = inlined_call_operand.vmem [shape: f32[16,128], index: 3, kind: output, shape index: {}]  }
   0x1   :  { %v16_v0 = vld [vmem:[%s440_s1] sm:$0xff]  ;;  %v17_v1 = vld [vmem:[%s440_s1 + $0x8] sm:$0xff]  ;;  %vm345_vm1 = vmpackc.low %vm39_vm0, %vm39_vm0 }
   0x2   :  { %v265_v3 = vpack.c.bf16 %v17_v1, %v16_v0  ;;  %v18_v4 = vld [vmem:[%s440_s1 + $0x10] sm:$0xff]  ;;  %v19_v5 = vld [vmem:[%s440_s1 + $0x18] sm:$0xff]  ;;  %v14_v7 = vld [vmem:[%s441_s0] sm:$0xff] }
   0x3   :  { %v271_v6 = vpack.c.bf16 %v19_v5, %v18_v4  ;;  %v20_v8 = vld [vmem:[%s440_s1 + $0x20] sm:$0xff]  ;;  %v21_v9 = vld [vmem:[%s440_s1 + $0x28] sm:$0xff]  ;;  %262 = vmatprep.mubr.msk.f32.mxu0 %vm39_vm0, %v14_v7  ;;  %v22_v11 = vld [vmem:[%s440_s1 + $0x30] sm:$0xff] }
   0x4   :  { %267 = vmatprep.subr.msk.bf16.mxu0 %vm345_vm1, %v265_v3  ;;  %v277_v10 = vpack.c.bf16 %v21_v9, %v20_v8  ;;  %v23_v12 = vld [vmem:[%s440_s1 + $0x38] sm:$0xff]  ;;  %v24_v14 = vld [vmem:[%s440_s1 + $0x40] sm:$0xff]  ;;  %v25_v15 = vld [vmem:[%s440_s1 + $0x48] sm:$0xff] }
   0x5   :  { %270 = vmatpush3.bf16.xpose.msk.msra.mxu0 %vm345_vm1, %v265_v3  ;;  %v283_v13 = vpack.c.bf16 %v23_v12, %v22_v11  ;;  %v289_v16 = vpack.c.bf16 %v25_v15, %v24_v14  ;;  %v26_v17 = vld [vmem:[%s440_s1 + $0x50] sm:$0xff]  ;;  %v27_v18 = vld [vmem:[%s440_s1 + $0x58] sm:$0xff]  ;;  %v28_v20 = vld [vmem:[%s440_s1 + $0x60] sm:$0xff] }
   0x6   :  { %273 = vmatprep.subr.msk.bf16.mxu0 %vm345_vm1, %v271_v6  ;;  %v295_v19 = vpack.c.bf16 %v27_v18, %v26_v17  ;;  %v29_v21 = vld [vmem:[%s440_s1 + $0x68] sm:$0xff]  ;;  %v30_v23 = vld [vmem:[%s440_s1 + $0x70] sm:$0xff]  ;;  %v31_v24 = vld [vmem:[%s440_s1 + $0x78] sm:$0xff] }
   0x7   :  { %v301_v22 = vpack.c.bf16 %v29_v21, %v28_v20  ;;  %v307_v25 = vpack.c.bf16 %v31_v24, %v30_v23  ;;  %v15_v26 = vld [vmem:[%s441_s0 + $0x8] sm:$0xff]  ;;  %v193_v27 = vld [vmem:[%s442_s2] ss:$0 sm:$0xff] }
   0xd   :  { %276 = vmatpush3.bf16.xpose.msk.msra.mxu0 %vm345_vm1, %v271_v6 }
   0xe   :  { %279 = vmatprep.subr.msk.bf16.mxu0 %vm345_vm1, %v277_v10 }
  0x15   :  { %282 = vmatpush3.bf16.xpose.msk.msra.mxu0 %vm345_vm1, %v277_v10 }
  0x16   :  { %285 = vmatprep.subr.msk.bf16.mxu0 %vm345_vm1, %v283_v13 }
  0x1d   :  { %288 = vmatpush3.bf16.xpose.msk.msra.mxu0 %vm345_vm1, %v283_v13 }
  0x1e   :  { %291 = vmatprep.subr.msk.bf16.mxu0 %vm345_vm1, %v289_v16 }
  0x25   :  { %294 = vmatpush3.bf16.xpose.msk.msra.mxu0 %vm345_vm1, %v289_v16 }
  0x26   :  { %297 = vmatprep.subr.msk.bf16.mxu0 %vm345_vm1, %v295_v19 }
  0x2d   :  { %300 = vmatpush3.bf16.xpose.msk.msra.mxu0 %vm345_vm1, %v295_v19 }
  0x2e   :  { %303 = vmatprep.subr.msk.bf16.mxu0 %vm345_vm1, %v301_v22 }
  0x35   :  { %306 = vmatpush3.bf16.xpose.msk.msra.mxu0 %vm345_vm1, %v301_v22 }
  0x36   :  { %309 = vmatprep.subr.msk.bf16.mxu0 %vm345_vm1, %v307_v25 }
  0x3d   :  { %312 = vmatpush3.bf16.xpose.msk.msra.mxu0 %vm345_vm1, %v307_v25 }
  0x44   :  { %263 = vmatmul.mubr.msk.f32.vlgmr.msra.gmra.mrb[0].mxu0 %vm39_vm0, %v15_v26 }
 0x117   :  { %v264_v28 = vpop.f32.mrb[0].mxu0 }
 0x118   :  { %v166_v29 = vadd.f32 %v264_v28, %v193_v27  ;;  %v160_v30 = vpop.f32.mrb[1].mxu0 }
 0x119   :  { %v161_v31 = vadd.f32 %v193_v27, %v160_v30 }
 0x11a   :  { %v172_v32 = vmul.f32 0.044715, %v166_v29  ;;  %v170_v44 = vmul.f32 0.5, %v166_v29 }
 0x11b   :  { %v171_v33 = vmul.f32 0.044715, %v161_v31  ;;  %v169_v46 = vmul.f32 0.5, %v161_v31 }
 0x11c   :  { %v174_v34 = vmul.f32 %v172_v32, %v166_v29 }
 0x11d   :  { %v173_v35 = vmul.f32 %v171_v33, %v161_v31 }
 0x11e   :  { %v176_v36 = vmul.f32 %v174_v34, %v166_v29 }
 0x11f   :  { %v175_v37 = vmul.f32 %v173_v35, %v161_v31 }
 0x120   :  { %v178_v38 = vadd.f32 %v176_v36, %v166_v29 }
 0x121   :  { %v177_v39 = vadd.f32 %v175_v37, %v161_v31 }
 0x122   :  { %v180_v40 = vmul.f32 0.7978846, %v178_v38 }
 0x123   :  { %v179_v41 = vmul.f32 0.7978846, %v177_v39 }
 0x124   :  { %313 = vtanh.f32 %v180_v40 }
 0x125   :  { %315 = vtanh.f32 %v179_v41 }
 0x12e   :  { %v314_v42 = vpop.eup %313 }
 0x12f   :  { %v316_v43 = vpop.eup %315  ;;  %v184_v45 = vadd.f32 1.0, %v314_v42 }
 0x130   :  { %v183_v47 = vadd.f32 1.0, %v316_v43 }
 0x131   :  { %v186_v48 = vmul.f32 %v184_v45, %v170_v44 }
 0x132   :  { %v185_v49 = vmul.f32 %v183_v47, %v169_v46 }
 0x133   :  { %188 = vst [vmem:[%s443_s3 + $0x8] sm:$0xff] %v186_v48 }
 0x134   :  { %187 = vst [vmem:[%s443_s3] sm:$0xff] %v185_v49 }

// kernel: gpt2_forward.31
= control target key start
LH: loop header
LB: loop body
LE: loop exit
PB: predicated region body
PF: predicated region fallthrough
CT: control target
= control target key end

     0   :  { %vm85_vm0 = vcmask 261120   ;;  %v211_v0 = vmov 0.0   ;;  %vm212_vm1 = vmmov 0   ;;  %s278_s1 = inlined_call_operand.vmem [shape: bf16[128,32], index: 1, kind: input, shape index: {}]   ;;  %s279_s0 = inlined_call_operand.vmem [shape: bf16[16,32], index: 0, kind: input, shape index: {}]   ;;  %s280_s2 = inlined_call_operand.vmem [shape: f32[1,128], index: 2, kind: input, shape index: {}]   ;;  %s281_s3 = inlined_call_operand.vmem [shape: f32[16,128], index: 3, kind: output, shape index: {}]  }
   0x1   :  { %180 = vmatprep.subr.bf16.mxu0 %v211_v0  ;;  %v202_v1 = vld [vmem:[%s278_s1] sm:$0xff]   ;;  %196 = vmatprep.mubr.msk.bf16.mxu0 %vm212_vm1, %v211_v0  ;;  %v203_v3 = vld [vmem:[%s278_s1 + $0x8] sm:$0xff]   ;;  %v204_v5 = vld [vmem:[%s278_s1 + $0x10] sm:$0xff]  }
   0x2   :  { %v90_v2 = vsel %vm85_vm0, %v202_v1, 0  ;;  %v93_v4 = vsel %vm85_vm0, %v203_v3, 0  ;;  %v96_v6 = vsel %vm85_vm0, %v204_v5, 0  ;;  %v205_v7 = vld [vmem:[%s278_s1 + $0x18] sm:$0xff]   ;;  %v206_v9 = vld [vmem:[%s278_s1 + $0x20] sm:$0xff]   ;;  %v207_v11 = vld [vmem:[%s278_s1 + $0x28] sm:$0xff]  }
   0x3   :  { %181 = vmatpush3.bf16.xpose.msra.mxu0 %v90_v2  ;;  %v99_v8 = vsel %vm85_vm0, %v205_v7, 0  ;;  %v102_v10 = vsel %vm85_vm0, %v206_v9, 0  ;;  %v105_v12 = vsel %vm85_vm0, %v207_v11, 0  ;;  %v208_v13 = vld [vmem:[%s278_s1 + $0x30] sm:$0xff]   ;;  %v209_v15 = vld [vmem:[%s278_s1 + $0x38] sm:$0xff]   ;;  %v210_v17 = vld [vmem:[%s279_s0] sm:$0xff]  }
   0x4   :  { %182 = vmatprep.subr.bf16.mxu0 %v211_v0  ;;  %v108_v14 = vsel %vm85_vm0, %v208_v13, 0  ;;  %v111_v16 = vsel %vm85_vm0, %v209_v15, 0  ;;  %v160_v18 = vld [vmem:[%s280_s2] ss:$0 sm:$0xff] }
   0xb   :  { %183 = vmatpush3.bf16.xpose.msra.mxu0 %v93_v4 }
   0xc   :  { %184 = vmatprep.subr.bf16.mxu0 %v211_v0 }
  0x13   :  { %185 = vmatpush3.bf16.xpose.msra.mxu0 %v96_v6 }
  0x14   :  { %186 = vmatprep.subr.bf16.mxu0 %v211_v0 }
  0x1b   :  { %187 = vmatpush3.bf16.xpose.msra.mxu0 %v99_v8 }
  0x1c   :  { %188 = vmatprep.subr.bf16.mxu0 %v211_v0 }
  0x23   :  { %189 = vmatpush3.bf16.xpose.msra.mxu0 %v102_v10 }
  0x24   :  { %190 = vmatprep.subr.bf16.mxu0 %v211_v0 }
  0x2b   :  { %191 = vmatpush3.bf16.xpose.msra.mxu0 %v105_v12 }
  0x2c   :  { %192 = vmatprep.subr.bf16.mxu0 %v211_v0 }
  0x33   :  { %193 = vmatpush3.bf16.xpose.msra.mxu0 %v108_v14 }
  0x34   :  { %194 = vmatprep.subr.bf16.mxu0 %v211_v0 }
  0x3b   :  { %195 = vmatpush3.bf16.xpose.msra.mxu0 %v111_v16 }
  0x42   :  { %197 = vmatmul.mubr.msk.bf16.vlgmr.msra.gmra.mrb[0].mxu0 %vm85_vm0, %v210_v17 }
 0x115   :  { %v147_v19 = vpop.f32.mrb[0].mxu0 }
 0x116   :  { %v148_v20 = vadd.f32 %v160_v18, %v147_v19  ;;  %v198_v21 = vpop.f32.mrb[1].mxu0 }
 0x117   :  { %v150_v22 = vpop.f32.mrb[2].mxu0 }
 0x118   :  { %154 = vst [vmem:[%s281_s3] sm:$0xff] %v148_v20  ;;  %v151_v23 = vadd.f32 %v160_v18, %v150_v22  ;;  %v199_v24 = vpop.f32.mrb[3].mxu0 }
 0x11a   :  { %155 = vst [vmem:[%s281_s3 + $0x8] sm:$0xff] %v151_v23 }

</bundles_post_ra>
